<compile_context>
chip_gen: v7x
topology: tpu7x:2x2x1
jax: 0.10.0
libtpu: 0.0.40
codegen_flags: <defaults>
</compile_context>

<pallas_src>
import functools

import jax
import jax.numpy as jnp
from jax import lax
from jax.experimental import pallas as pl
from jax.experimental.pallas import tpu as pltpu

EPS = 1e-5  # torch.nn.InstanceNorm2d default eps


def _upsampling_block_kernel(x_ref, w_ref, b_ref, m_ref, o_ref,
                             *, c_in, hw, wu, inv_hw):
    # x_ref: (1, C_in, HW + 2*(Wu+1))  flattened upsampled image + replicated-row halo
    # w_ref: (C_out, 9*C_in)           conv weight, 3x3 taps folded into the K dim
    # b_ref: (C_out, 1)                conv bias (f32)
    # m_ref: (2, HW)                   column-boundary masks (first col / last col), 0/1 f32
    # o_ref: (1, C_out, HW)            instance-normalized output
    pad = wu + 1
    m_first = m_ref[0:1, :] > 0.5      # (1, HW) bool, column 0 of each upsampled row
    m_last = m_ref[1:2, :] > 0.5       # (1, HW) bool, column Wu-1 of each upsampled row

    # Nine accumulating MXU dots, one per 3x3 tap.  Row clamping is handled by the one-row
    # halo; column clamping is a single select against the unshifted (dc == 0) tap.
    acc = None
    k = 0
    for dr in (-1, 0, 1):
        center = x_ref[0, :, pl.ds(pad + dr * wu, hw)]               # (C_in, HW)
        for dc in (-1, 0, 1):
            if dc == 0:
                tap = center
            else:
                shifted = x_ref[0, :, pl.ds(pad + dr * wu + dc, hw)]
                tap = jnp.where(m_first if dc < 0 else m_last, center, shifted)
            w_k = w_ref[:, pl.ds(k * c_in, c_in)]                    # (C_out, C_in)
            part = jnp.dot(w_k, tap, preferred_element_type=jnp.float32)
            acc = part if acc is None else acc + part
            k += 1

    acc = jnp.maximum(acc + b_ref[...], 0.0)     # bias + ReLU (clamp(min=0)), f32

    # InstanceNorm2d (affine=False): single-pass moments in f32 (fine at 1e-3 tolerance).
    s = jnp.sum(acc, axis=1, keepdims=True)
    ss = jnp.sum(acc * acc, axis=1, keepdims=True)
    mean = s * inv_hw
    var = jnp.maximum(ss * inv_hw - mean * mean, 0.0)
    o_ref[0] = ((acc - mean) * lax.rsqrt(var + EPS)).astype(o_ref.dtype)


def _device_vmem_bytes():
    """Per-TensorCore VMEM capacity, with a safe fallback (v7x = 64 MiB)."""
    try:
        cap = getattr(pltpu.get_tpu_info(), "vmem_capacity_bytes", None)
        if cap:
            return int(cap)
    except Exception:
        pass
    return 64 * 1024 * 1024


@functools.partial(jax.jit, static_argnames=("compute_dtype", "out_dtype"))
def upsampling_block(x, weight, bias, *,
                     compute_dtype=jnp.float32, out_dtype=jnp.float32):
    """x: (N, C_in, H, W); weight: (C_out, C_in, 3, 3); bias: (C_out,) -> (N, C_out, 2H, 2W)."""
    N, C_in, H, W = x.shape
    C_out = weight.shape[0]
    Hu, Wu = 2 * H, 2 * W
    HW = Hu * Wu
    HWP = HW + 2 * (Wu + 1)

    # Nearest-x2 upsample + one replicated edge row (plus one element) of halo per side,
    # built as a single concat so XLA fuses the repeat + halo into one producer under jit.
    up = jnp.repeat(jnp.repeat(x, 2, axis=2), 2, axis=3).astype(compute_dtype)
    uf = up.reshape(N, C_in, HW)
    xpad = jnp.concatenate(
        [uf[:, :, :1], uf[:, :, :Wu],                 # top: first row replicated
         uf,
         uf[:, :, HW - Wu:], uf[:, :, HW - 1:]],      # bottom: last row replicated
        axis=-1)                                      # (N, C_in, HWP)

    # Weight with taps folded into K: lhs[o, (ky*3+kx)*C_in + c] = weight[o, c, ky, kx].
    w_lhs = jnp.transpose(weight, (0, 2, 3, 1)).reshape(C_out, 9 * C_in).astype(compute_dtype)
    b2 = bias.reshape(C_out, 1).astype(jnp.float32)

    # Column-boundary masks (first / last column of each upsampled row), selected with where.
    col = jnp.arange(HW, dtype=jnp.int32) % Wu
    edge_mask = jnp.stack([col == 0, col == Wu - 1]).astype(jnp.float32)   # (2, HW)

    # VMEM budget: double-buffered in/out blocks + params + f32 working values, capped by
    # the actual device capacity minus headroom (v7x: 64 MiB per TensorCore).
    cap = _device_vmem_bytes()
    isz = jnp.dtype(compute_dtype).itemsize
    osz = jnp.dtype(out_dtype).itemsize
    est = (2 * C_in * HWP * isz
           + 2 * C_out * HW * osz
           + C_out * 9 * C_in * isz + C_out * 4 + 2 * 2 * HW * 4
           + (4 * C_out + 6 * C_in) * HW * 4)
    vmem_limit = int(min(max(2 * est, 32 * 1024 * 1024), cap - 2 * 1024 * 1024))

    kernel = functools.partial(_upsampling_block_kernel,
                               c_in=C_in, hw=HW, wu=Wu, inv_hw=1.0 / HW)

    out_flat = pl.pallas_call(
        kernel,
        out_shape=jax.ShapeDtypeStruct((N, C_out, HW), out_dtype),
        grid_spec=pltpu.PrefetchScalarGridSpec(
            num_scalar_prefetch=0,
            grid=(N,),
            in_specs=[
                pl.BlockSpec((1, C_in, HWP), lambda n: (n, 0, 0)),
                pl.BlockSpec((C_out, 9 * C_in), lambda n: (0, 0)),
                pl.BlockSpec((C_out, 1), lambda n: (0, 0)),
                pl.BlockSpec((2, HW), lambda n: (0, 0)),
            ],
            out_specs=pl.BlockSpec((1, C_out, HW), lambda n: (n, 0, 0)),
        ),
        compiler_params=pltpu.CompilerParams(
            dimension_semantics=("parallel",),
            vmem_limit_bytes=vmem_limit,
        ),
    )(xpad, w_lhs, b2, edge_mask)

    return out_flat.reshape(N, C_out, Hu, Wu)


def reference(x, weight, bias):
    """Pure-JAX reference matching the PyTorch forward."""
    up = jnp.repeat(jnp.repeat(x, 2, axis=2), 2, axis=3)
    xp = jnp.pad(up, ((0, 0), (0, 0), (1, 1), (1, 1)), mode="reflect")
    conv = lax.conv_general_dilated(
        xp, weight, window_strides=(1, 1), padding="VALID",
        dimension_numbers=("NCHW", "OIHW", "NCHW"))
    conv = conv + bias[None, :, None, None]
    relu = jnp.maximum(conv, 0.0)
    mean = jnp.mean(relu, axis=(2, 3), keepdims=True)
    var = jnp.mean((relu - mean) ** 2, axis=(2, 3), keepdims=True)
    return (relu - mean) / jnp.sqrt(var + EPS)


if __name__ == "__main__":
    key = jax.random.PRNGKey(0)
    k_x, k_w, k_b = jax.random.split(key, 3)

    N, C_in, H, W = 2, 4, 16, 16
    C_out = 8

    x = jax.random.normal(k_x, (N, C_in, H, W), dtype=jnp.float32)
    # Deterministic synthetic parameters (Conv2d(4, 8, kernel_size=3))
    weight = 0.1 * jax.random.normal(k_w, (C_out, C_in, 3, 3), dtype=jnp.float32)
    bias = 0.1 * jax.random.normal(k_b, (C_out,), dtype=jnp.float32)

    out = jax.block_until_ready(upsampling_block(x, weight, bias))
    ref = jax.block_until_ready(reference(x, weight, bias))

    assert out.shape == (N, C_out, 2 * H, 2 * W), out.shape
    assert jnp.allclose(out, ref, atol=1e-3, rtol=1e-3), \
        float(jnp.max(jnp.abs(out - ref)))

    print("KERNEL_OK")
</pallas_src>

<mosaic_0001>
module attributes {stable_mosaic.version = 11 : i64} {
  func.func @_upsampling_block_kernel(%arg0: i32, %arg1: memref<1x4x1090xf32, #tpu.memory_space<vmem>>, %arg2: memref<8x36xf32, #tpu.memory_space<vmem>>, %arg3: memref<8x1xf32, #tpu.memory_space<vmem>>, %arg4: memref<2x1024xf32, #tpu.memory_space<vmem>>, %arg5: memref<1x8x1024xf32, #tpu.memory_space<vmem>>) attributes {dimension_semantics = [#tpu.dimension_semantics<parallel>], iteration_bounds = array<i64: 2>, scalar_prefetch = 0 : i64, scratch_operands = 0 : i64, tpu.core_type = #tpu.core_type<tc>, window_params = [{transform_indices = @transform_0, window_bounds = array<i64: 1, 4, 1090>}, {pipeline_mode = #tpu.pipeline_mode<synchronous>, transform_indices = @transform_1, window_bounds = array<i64: 8, 36>}, {pipeline_mode = #tpu.pipeline_mode<synchronous>, transform_indices = @transform_2, window_bounds = array<i64: 8, 1>}, {pipeline_mode = #tpu.pipeline_mode<synchronous>, transform_indices = @transform_3, window_bounds = array<i64: 2, 1024>}, {transform_indices = @transform_4, window_bounds = array<i64: 1, 8, 1024>}]} {
    %c0 = arith.constant 0 : index
    %c0_0 = arith.constant 0 : index
    %0 = vector.load %arg4[%c0, %c0_0] : memref<2x1024xf32, #tpu.memory_space<vmem>>, vector<1x1024xf32>
    %cst = arith.constant 5.000000e-01 : f32
    %1 = vector.broadcast %cst : f32 to vector<1x1024xf32>
    %2 = arith.cmpf ogt, %0, %1 : vector<1x1024xf32>
    %c1 = arith.constant 1 : index
    %c0_1 = arith.constant 0 : index
    %3 = vector.load %arg4[%c1, %c0_1] : memref<2x1024xf32, #tpu.memory_space<vmem>>, vector<1x1024xf32>
    %cst_2 = arith.constant 5.000000e-01 : f32
    %4 = vector.broadcast %cst_2 : f32 to vector<1x1024xf32>
    %5 = arith.cmpf ogt, %3, %4 : vector<1x1024xf32>
    %c0_3 = arith.constant 0 : index
    %c0_4 = arith.constant 0 : index
    %c1_5 = arith.constant 1 : index
    %6 = vector.load %arg1[%c0_3, %c0_4, %c1_5] : memref<1x4x1090xf32, #tpu.memory_space<vmem>>, vector<1x4x1024xf32>
    %7 = vector.shape_cast %6 : vector<1x4x1024xf32> to vector<4x1024xf32>
    %c0_6 = arith.constant 0 : index
    %c0_7 = arith.constant 0 : index
    %c0_8 = arith.constant 0 : index
    %8 = vector.load %arg1[%c0_6, %c0_7, %c0_8] : memref<1x4x1090xf32, #tpu.memory_space<vmem>>, vector<1x4x1024xf32>
    %9 = vector.shape_cast %8 : vector<1x4x1024xf32> to vector<4x1024xf32>
    %10 = vector.shape_cast %2 : vector<1x1024xi1> to vector<1x1024xi1>
    %11 = vector.broadcast %10 : vector<1x1024xi1> to vector<4x1024xi1>
    %12 = arith.select %11, %7, %9 : vector<4x1024xi1>, vector<4x1024xf32>
    %c0_9 = arith.constant 0 : index
    %c0_10 = arith.constant 0 : index
    %13 = vector.load %arg2[%c0_9, %c0_10] : memref<8x36xf32, #tpu.memory_space<vmem>>, vector<8x4xf32>
    %cst_11 = arith.constant dense<0.000000e+00> : vector<8x1024xf32>
    %14 = tpu.matmul %13, %12, %cst_11 {dimension_numbers = #tpu.dot_dimension_numbers<[1], [0], [0], [1], [0, 0, 1, 1], [], []>} : vector<8x4xf32>, vector<4x1024xf32>, vector<8x1024xf32> -> vector<8x1024xf32>
    %c0_12 = arith.constant 0 : index
    %c4 = arith.constant 4 : index
    %15 = vector.load %arg2[%c0_12, %c4] : memref<8x36xf32, #tpu.memory_space<vmem>>, vector<8x4xf32>
    %cst_13 = arith.constant dense<0.000000e+00> : vector<8x1024xf32>
    %16 = tpu.matmul %15, %7, %cst_13 {dimension_numbers = #tpu.dot_dimension_numbers<[1], [0], [0], [1], [0, 0, 1, 1], [], []>} : vector<8x4xf32>, vector<4x1024xf32>, vector<8x1024xf32> -> vector<8x1024xf32>
    %17 = arith.addf %14, %16 : vector<8x1024xf32>
    %c0_14 = arith.constant 0 : index
    %c0_15 = arith.constant 0 : index
    %c2 = arith.constant 2 : index
    %18 = vector.load %arg1[%c0_14, %c0_15, %c2] : memref<1x4x1090xf32, #tpu.memory_space<vmem>>, vector<1x4x1024xf32>
    %19 = vector.shape_cast %18 : vector<1x4x1024xf32> to vector<4x1024xf32>
    %20 = vector.shape_cast %5 : vector<1x1024xi1> to vector<1x1024xi1>
    %21 = vector.broadcast %20 : vector<1x1024xi1> to vector<4x1024xi1>
    %22 = arith.select %21, %7, %19 : vector<4x1024xi1>, vector<4x1024xf32>
    %c0_16 = arith.constant 0 : index
    %c8 = arith.constant 8 : index
    %23 = vector.load %arg2[%c0_16, %c8] : memref<8x36xf32, #tpu.memory_space<vmem>>, vector<8x4xf32>
    %cst_17 = arith.constant dense<0.000000e+00> : vector<8x1024xf32>
    %24 = tpu.matmul %23, %22, %cst_17 {dimension_numbers = #tpu.dot_dimension_numbers<[1], [0], [0], [1], [0, 0, 1, 1], [], []>} : vector<8x4xf32>, vector<4x1024xf32>, vector<8x1024xf32> -> vector<8x1024xf32>
    %25 = arith.addf %17, %24 : vector<8x1024xf32>
    %c0_18 = arith.constant 0 : index
    %c0_19 = arith.constant 0 : index
    %c33 = arith.constant 33 : index
    %26 = vector.load %arg1[%c0_18, %c0_19, %c33] : memref<1x4x1090xf32, #tpu.memory_space<vmem>>, vector<1x4x1024xf32>
    %27 = vector.shape_cast %26 : vector<1x4x1024xf32> to vector<4x1024xf32>
    %c0_20 = arith.constant 0 : index
    %c0_21 = arith.constant 0 : index
    %c32 = arith.constant 32 : index
    %28 = vector.load %arg1[%c0_20, %c0_21, %c32] : memref<1x4x1090xf32, #tpu.memory_space<vmem>>, vector<1x4x1024xf32>
    %29 = vector.shape_cast %28 : vector<1x4x1024xf32> to vector<4x1024xf32>
    %30 = vector.shape_cast %2 : vector<1x1024xi1> to vector<1x1024xi1>
    %31 = vector.broadcast %30 : vector<1x1024xi1> to vector<4x1024xi1>
    %32 = arith.select %31, %27, %29 : vector<4x1024xi1>, vector<4x1024xf32>
    %c0_22 = arith.constant 0 : index
    %c12 = arith.constant 12 : index
    %33 = vector.load %arg2[%c0_22, %c12] : memref<8x36xf32, #tpu.memory_space<vmem>>, vector<8x4xf32>
    %cst_23 = arith.constant dense<0.000000e+00> : vector<8x1024xf32>
    %34 = tpu.matmul %33, %32, %cst_23 {dimension_numbers = #tpu.dot_dimension_numbers<[1], [0], [0], [1], [0, 0, 1, 1], [], []>} : vector<8x4xf32>, vector<4x1024xf32>, vector<8x1024xf32> -> vector<8x1024xf32>
    %35 = arith.addf %25, %34 : vector<8x1024xf32>
    %c0_24 = arith.constant 0 : index
    %c16 = arith.constant 16 : index
    %36 = vector.load %arg2[%c0_24, %c16] : memref<8x36xf32, #tpu.memory_space<vmem>>, vector<8x4xf32>
    %cst_25 = arith.constant dense<0.000000e+00> : vector<8x1024xf32>
    %37 = tpu.matmul %36, %27, %cst_25 {dimension_numbers = #tpu.dot_dimension_numbers<[1], [0], [0], [1], [0, 0, 1, 1], [], []>} : vector<8x4xf32>, vector<4x1024xf32>, vector<8x1024xf32> -> vector<8x1024xf32>
    %38 = arith.addf %35, %37 : vector<8x1024xf32>
    %c0_26 = arith.constant 0 : index
    %c0_27 = arith.constant 0 : index
    %c34 = arith.constant 34 : index
    %39 = vector.load %arg1[%c0_26, %c0_27, %c34] : memref<1x4x1090xf32, #tpu.memory_space<vmem>>, vector<1x4x1024xf32>
    %40 = vector.shape_cast %39 : vector<1x4x1024xf32> to vector<4x1024xf32>
    %41 = vector.shape_cast %5 : vector<1x1024xi1> to vector<1x1024xi1>
    %42 = vector.broadcast %41 : vector<1x1024xi1> to vector<4x1024xi1>
    %43 = arith.select %42, %27, %40 : vector<4x1024xi1>, vector<4x1024xf32>
    %c0_28 = arith.constant 0 : index
    %c20 = arith.constant 20 : index
    %44 = vector.load %arg2[%c0_28, %c20] : memref<8x36xf32, #tpu.memory_space<vmem>>, vector<8x4xf32>
    %cst_29 = arith.constant dense<0.000000e+00> : vector<8x1024xf32>
    %45 = tpu.matmul %44, %43, %cst_29 {dimension_numbers = #tpu.dot_dimension_numbers<[1], [0], [0], [1], [0, 0, 1, 1], [], []>} : vector<8x4xf32>, vector<4x1024xf32>, vector<8x1024xf32> -> vector<8x1024xf32>
    %46 = arith.addf %38, %45 : vector<8x1024xf32>
    %c0_30 = arith.constant 0 : index
    %c0_31 = arith.constant 0 : index
    %c65 = arith.constant 65 : index
    %47 = vector.load %arg1[%c0_30, %c0_31, %c65] : memref<1x4x1090xf32, #tpu.memory_space<vmem>>, vector<1x4x1024xf32>
    %48 = vector.shape_cast %47 : vector<1x4x1024xf32> to vector<4x1024xf32>
    %c0_32 = arith.constant 0 : index
    %c0_33 = arith.constant 0 : index
    %c64 = arith.constant 64 : index
    %49 = vector.load %arg1[%c0_32, %c0_33, %c64] : memref<1x4x1090xf32, #tpu.memory_space<vmem>>, vector<1x4x1024xf32>
    %50 = vector.shape_cast %49 : vector<1x4x1024xf32> to vector<4x1024xf32>
    %51 = vector.shape_cast %2 : vector<1x1024xi1> to vector<1x1024xi1>
    %52 = vector.broadcast %51 : vector<1x1024xi1> to vector<4x1024xi1>
    %53 = arith.select %52, %48, %50 : vector<4x1024xi1>, vector<4x1024xf32>
    %c0_34 = arith.constant 0 : index
    %c24 = arith.constant 24 : index
    %54 = vector.load %arg2[%c0_34, %c24] : memref<8x36xf32, #tpu.memory_space<vmem>>, vector<8x4xf32>
    %cst_35 = arith.constant dense<0.000000e+00> : vector<8x1024xf32>
    %55 = tpu.matmul %54, %53, %cst_35 {dimension_numbers = #tpu.dot_dimension_numbers<[1], [0], [0], [1], [0, 0, 1, 1], [], []>} : vector<8x4xf32>, vector<4x1024xf32>, vector<8x1024xf32> -> vector<8x1024xf32>
    %56 = arith.addf %46, %55 : vector<8x1024xf32>
    %c0_36 = arith.constant 0 : index
    %c28 = arith.constant 28 : index
    %57 = vector.load %arg2[%c0_36, %c28] : memref<8x36xf32, #tpu.memory_space<vmem>>, vector<8x4xf32>
    %cst_37 = arith.constant dense<0.000000e+00> : vector<8x1024xf32>
    %58 = tpu.matmul %57, %48, %cst_37 {dimension_numbers = #tpu.dot_dimension_numbers<[1], [0], [0], [1], [0, 0, 1, 1], [], []>} : vector<8x4xf32>, vector<4x1024xf32>, vector<8x1024xf32> -> vector<8x1024xf32>
    %59 = arith.addf %56, %58 : vector<8x1024xf32>
    %c0_38 = arith.constant 0 : index
    %c0_39 = arith.constant 0 : index
    %c66 = arith.constant 66 : index
    %60 = vector.load %arg1[%c0_38, %c0_39, %c66] : memref<1x4x1090xf32, #tpu.memory_space<vmem>>, vector<1x4x1024xf32>
    %61 = vector.shape_cast %60 : vector<1x4x1024xf32> to vector<4x1024xf32>
    %62 = vector.shape_cast %5 : vector<1x1024xi1> to vector<1x1024xi1>
    %63 = vector.broadcast %62 : vector<1x1024xi1> to vector<4x1024xi1>
    %64 = arith.select %63, %48, %61 : vector<4x1024xi1>, vector<4x1024xf32>
    %c0_40 = arith.constant 0 : index
    %c32_41 = arith.constant 32 : index
    %65 = vector.load %arg2[%c0_40, %c32_41] : memref<8x36xf32, #tpu.memory_space<vmem>>, vector<8x4xf32>
    %cst_42 = arith.constant dense<0.000000e+00> : vector<8x1024xf32>
    %66 = tpu.matmul %65, %64, %cst_42 {dimension_numbers = #tpu.dot_dimension_numbers<[1], [0], [0], [1], [0, 0, 1, 1], [], []>} : vector<8x4xf32>, vector<4x1024xf32>, vector<8x1024xf32> -> vector<8x1024xf32>
    %67 = arith.addf %59, %66 : vector<8x1024xf32>
    %c0_43 = arith.constant 0 : index
    %c0_44 = arith.constant 0 : index
    %68 = vector.load %arg3[%c0_43, %c0_44] : memref<8x1xf32, #tpu.memory_space<vmem>>, vector<8x1xf32>
    %69 = vector.broadcast %68 : vector<8x1xf32> to vector<8x1024xf32>
    %70 = arith.addf %67, %69 : vector<8x1024xf32>
    %cst_45 = arith.constant 0.000000e+00 : f32
    %71 = vector.broadcast %cst_45 : f32 to vector<8x1024xf32>
    %72 = arith.maximumf %70, %71 : vector<8x1024xf32>
    %cst_46 = arith.constant dense<0.000000e+00> : vector<8xf32>
    %73 = vector.multi_reduction <add>, %72, %cst_46 [1] : vector<8x1024xf32> to vector<8xf32>
    %74 = vector.shape_cast %73 : vector<8xf32> to vector<8x1xf32>
    %75 = arith.mulf %72, %72 : vector<8x1024xf32>
    %cst_47 = arith.constant dense<0.000000e+00> : vector<8xf32>
    %76 = vector.multi_reduction <add>, %75, %cst_47 [1] : vector<8x1024xf32> to vector<8xf32>
    %77 = vector.shape_cast %76 : vector<8xf32> to vector<8x1xf32>
    %cst_48 = arith.constant 9.765625E-4 : f32
    %78 = vector.broadcast %cst_48 : f32 to vector<8x1xf32>
    %79 = arith.mulf %74, %78 : vector<8x1xf32>
    %cst_49 = arith.constant 9.765625E-4 : f32
    %80 = vector.broadcast %cst_49 : f32 to vector<8x1xf32>
    %81 = arith.mulf %77, %80 : vector<8x1xf32>
    %82 = arith.mulf %79, %79 : vector<8x1xf32>
    %83 = arith.subf %81, %82 : vector<8x1xf32>
    %cst_50 = arith.constant 0.000000e+00 : f32
    %84 = vector.broadcast %cst_50 : f32 to vector<8x1xf32>
    %85 = arith.maximumf %83, %84 : vector<8x1xf32>
    %86 = vector.broadcast %79 : vector<8x1xf32> to vector<8x1024xf32>
    %87 = arith.subf %72, %86 : vector<8x1024xf32>
    %cst_51 = arith.constant 9.99999974E-6 : f32
    %88 = vector.broadcast %cst_51 : f32 to vector<8x1xf32>
    %89 = arith.addf %85, %88 : vector<8x1xf32>
    %90 = math.rsqrt %89 : vector<8x1xf32>
    %91 = vector.broadcast %90 : vector<8x1xf32> to vector<8x1024xf32>
    %92 = arith.mulf %87, %91 : vector<8x1024xf32>
    %c0_52 = arith.constant 0 : index
    %c0_53 = arith.constant 0 : index
    %c0_54 = arith.constant 0 : index
    %93 = vector.load %arg5[%c0_52, %c0_53, %c0_54] : memref<1x8x1024xf32, #tpu.memory_space<vmem>>, vector<1x8x1024xf32>
    %94 = vector.shape_cast %93 : vector<1x8x1024xf32> to vector<8x1024xf32>
    %95 = vector.shape_cast %92 : vector<8x1024xf32> to vector<1x8x1024xf32>
    tpu.vector_store %arg5[%c0_52, %c0_53, %c0_54], %95 {strides = array<i32>} : memref<1x8x1024xf32, #tpu.memory_space<vmem>>, vector<1x8x1024xf32>,
    return
  }
  func.func @transform_0(%arg0: i32) -> (i32, i32, i32) {
    %c0_i32 = arith.constant 0 : i32
    %c0_i32_0 = arith.constant 0 : i32
    %c0_i32_1 = arith.constant 0 : i32
    return %arg0, %c0_i32, %c0_i32_0 : i32, i32, i32
  }
  func.func @transform_1(%arg0: i32) -> (i32, i32) {
    %c0_i32 = arith.constant 0 : i32
    %c0_i32_0 = arith.constant 0 : i32
    %c0_i32_1 = arith.constant 0 : i32
    return %c0_i32, %c0_i32_0 : i32, i32
  }
  func.func @transform_2(%arg0: i32) -> (i32, i32) {
    %c0_i32 = arith.constant 0 : i32
    %c0_i32_0 = arith.constant 0 : i32
    %c0_i32_1 = arith.constant 0 : i32
    return %c0_i32, %c0_i32_0 : i32, i32
  }
  func.func @transform_3(%arg0: i32) -> (i32, i32) {
    %c0_i32 = arith.constant 0 : i32
    %c0_i32_0 = arith.constant 0 : i32
    %c0_i32_1 = arith.constant 0 : i32
    return %c0_i32, %c0_i32_0 : i32, i32
  }
  func.func @transform_4(%arg0: i32) -> (i32, i32, i32) {
    %c0_i32 = arith.constant 0 : i32
    %c0_i32_0 = arith.constant 0 : i32
    %c0_i32_1 = arith.constant 0 : i32
    return %arg0, %c0_i32, %c0_i32_0 : i32, i32, i32
  }
}

</mosaic_0001>

<bundles_post_ra>
// kernel: upsampling_block.1
= control target key start
LH: loop header
LB: loop body
LE: loop exit
PB: predicated region body
PF: predicated region fallthrough
CT: control target
= control target key end

     0   :  { %s3954_s15 = smov 0   ;;  %s4667_s0 = inlined_call_operand.vmem [shape: f32[2,4,1090], index: 0, kind: input, shape index: {}]   ;;  %s4668_s1 = inlined_call_operand.vmem [shape: f32[8,36], index: 1, kind: input, shape index: {}]   ;;  %s4669_s2 = inlined_call_operand.vmem [shape: f32[8,1], index: 2, kind: input, shape index: {}]   ;;  %s4670_s3 = inlined_call_operand.vmem [shape: f32[2,1024], index: 3, kind: input, shape index: {}]   ;;  %s4671_s4 = inlined_call_operand.vmem [shape: f32[2,8,1024], index: 4, kind: output, shape index: {}]  }
   0x1 LB: > { %s3687_s16 = sadd.s32 4294967295, %s3910_s15   ;;  %p3691_p0 = scmp.ge.s32.totalorder %s3910_s15, 1  ;;  %s3910_s15 = sphi %s3954_s15, %s14_s15  }
   0x2   : > { %p162_p1 = scmp.lt.s32.totalorder %s3910_s15, 3 }
   0x4   : > { %p163_p2 = pnand %p3691_p0, %p162_p1 }
   0x5   : > { %v3965_v0 = vld [vmem:[%s4668_s1] sm:$0xff] (!%p163_p2)  ;;  %p188_p3 = scmp.lt.s32.totalorder (!%p163_p2), %s3687_s16, 1  ;;  %s3912_s19 = smov (!%p163_p2), 124   ;;  %v3913_v1 = vmov (!%p163_p2), 0   ;;  %v3914_v2 = vmov (!%p163_p2), 0.0   ;;  %v209_v16 = vlaneseq (!%p163_p2)  ;;  %vm276_vm0 = vcmask (!%p163_p2), 1039360  }
   0x6   : > { %166 = sbr.rel (%p163_p2) target bundleno = 683 (0x2ab), region = 36  ;;  %307 = vrot.lane.b32.xlu1 (!%p163_p2), %v3965_v0, %s3912_s19  ;;  %3897 = vset.pattern.permute.xlu0 (!%p163_p2), %v3913_v1  ;;  %s3915_s24 = smov (!%p163_p2), 127   ;;  %v198_v19 = vld [vmem:[%s4670_s3] ss:$2 sm:$0xff] (!%p163_p2)  ;;  %vm312_vm1 = vcmask (!%p163_p2), 1043456   ;;  %vm309_vm3 = vcmask (!%p163_p2), 31744  }
   0x7   : > { %464 = vmatprep.mubr.f32.mxu1 (!%p163_p2), %v3914_v2  ;;  %393 = vmatprep.mubr.f32.mxu0 (!%p163_p2), %v3914_v2  ;;  %s3916_s25 = smov (!%p163_p2), 126   ;;  %s3917_s26 = smov (!%p163_p2), 120   ;;  %v4091_v20 = vshrl.u32 (!%p163_p2), %v209_v16, 7  ;;  %vm199_vm2 = vcmp.gt.f32.partialorder (!%p163_p2), %v198_v19, 0.5  ;;  %v3695_v27 = vld [vmem:[%s4670_s3 + $0x1] ss:$2 sm:$0xff] (!%p163_p2) }
   0x8   : > { %s3918_s27 = smov (!%p163_p2), 95   ;;  %s3919_s28 = smov (!%p163_p2), 96   ;;  %v208_v28 = vsel (!%p163_p2), %vm199_vm2, 1, %v3913_v1  ;;  %vm202_vm4 = vcmp.gt.f32.partialorder (!%p163_p2), %v3695_v27, 0.5  ;;  %vm996_vm11 = vcmask (!%p163_p2), 1031168  }
   0x9   : > { %s3920_s29 = smov (!%p163_p2), 116   ;;  %s3921_s30 = smov (!%p163_p2), 112   ;;  %v215_v23 = vsub.s32 (!%p163_p2), 1, %v4091_v20  ;;  %v211_v26 = vsub.s32 (!%p163_p2), 0, %v4091_v20  ;;  %v231_v29 = vsub.s32 (!%p163_p2), 5, %v4091_v20  ;;  %v219_v30 = vsub.s32 (!%p163_p2), 2, %v4091_v20 }
   0xa   : > { %s3922_s5 = smov (!%p163_p2), 94   ;;  %s3923_s6 = smov (!%p163_p2), 108   ;;  %v223_v34 = vsub.s32 (!%p163_p2), 3, %v4091_v20  ;;  %v227_v38 = vsub.s32 (!%p163_p2), 4, %v4091_v20  ;;  %v4152_v43 = vsel (!%p163_p2), %vm202_vm4, 1, %v3913_v1  ;;  %v239_v44 = vsub.s32 (!%p163_p2), 7, %v4091_v20 }
   0xb   : > { %s3924_s7 = smov (!%p163_p2), 63   ;;  %s3925_s8 = smov (!%p163_p2), 64   ;;  %v4117_v33 = vrot.slane (!%p163_p2), %v208_v28, %v215_v23  ;;  %v4125_v36 = vrot.slane (!%p163_p2), %v208_v28, %v211_v26  ;;  %v4142_v39 = vrot.slane (!%p163_p2), %v208_v28, %v231_v29  ;;  %v4146_v40 = vrot.slane (!%p163_p2), %v208_v28, %v219_v30 }
   0xc   : > { %v4165_v47 = vrot.slane (!%p163_p2), %v208_v28, %v223_v34  ;;  %v4169_v48 = vrot.slane (!%p163_p2), %v208_v28, %v227_v38  ;;  %v235_v49 = vsub.s32 (!%p163_p2), 6, %v4091_v20  ;;  %s3926_s13 = smov (!%p163_p2), 104   ;;  %v4185_v51 = vrot.slane (!%p163_p2), %v4152_v43, %v215_v23  ;;  %s3927_s14 = smov (!%p163_p2), 100  }
   0xd   : > { %s4687_s16 = smov (!%p188_p3, %s3687_s16), 1  ;;  %vm242_vm5 = vcmp.eq.s32.totalorder %v4117_v33, 1  ;;  %vm241_vm6 = vcmp.eq.s32.totalorder %v4125_v36, 1  ;;  %vm246_vm7 = vcmp.eq.s32.totalorder %v4142_v39, 1  ;;  %v4197_v56 = vrot.slane %v208_v28, %v239_v44  ;;  %s3928_s17 = smov 62  }
   0xe   : > { %s3871_s20 = smul.u32 36, %s4687_s16  ;;  %vm243_vm8 = vcmp.eq.s32.totalorder %v4146_v40, 1  ;;  %vm244_vm9 = vcmp.eq.s32.totalorder %v4165_v47, 1  ;;  %vm4676_vm10 = vcmp.eq.s32.totalorder %v4169_v48, 1  ;;  %v4212_v59 = vrot.slane %v208_v28, %v235_v49 }
   0xf   : > { %vm962_vm12 = vcmp.eq.s32.totalorder %v4185_v51, 1  ;;  %v4227_v61 = vrot.slane %v4152_v43, %v211_v26  ;;  %vm248_vm13 = vcmp.eq.s32.totalorder %v4197_v56, 1  ;;  %v4267_v16 = vrot.slane %v4152_v43, %v223_v34 }
  0x10   : > { %s3977_s23 = scalar_lea.vmem %s4667_s0, %s3871_s20  ;;  %vm247_vm14 = vcmp.eq.s32.totalorder %v4212_v59, 1  ;;  %v4297_v23 = vrot.slane %v4152_v43, %v231_v29  ;;  %s3806_s20 = sshll.u32 %s4687_s16, 6 }
  0x11   : > { %v3980_v3 = vld [vmem:[%s3977_s23 + $0x8] sm:$0xff]  ;;  %v3983_v4 = vld [vmem:[%s3977_s23] sm:$0xff]  ;;  %v3992_v6 = vld [vmem:[%s3977_s23 + $0x10] sm:$0xff]  ;;  %vm4674_vm15 = vcmp.eq.s32.totalorder %v4227_v61, 1 }
  0x12   : > { %262 = vrot.lane.b32.xlu0 %v3980_v3, %s3915_s24  ;;  %258 = vrot.lane.b32.xlu1 %v3983_v4, %s3915_s24  ;;  %v3989_v5 = vcombine.high %v3980_v3, %v3980_v3  ;;  %v3998_v7 = vcombine.high %v3983_v4, %v3983_v4  ;;  %v4001_v8 = vld [vmem:[%s3977_s23 + $0x18] sm:$0xff]  ;;  %v4007_v9 = vcombine.high %v3992_v6, %v3992_v6  ;;  %v207_v10 = vld [vmem:[%s3977_s23 + $0x20] sm:$0xf]  ;;  %vm966_vm4 = vcmp.eq.s32.totalorder %v4297_v23, 1 }
  0x13   : > { %v4013_v11 = vcombine.high %v4001_v8, %v4001_v8  ;;  %v927_v12 = vld [vmem:[%s3977_s23 + $0x20] sm:$0xf] }
  0x14   : > { %v1347_v13 = vld [vmem:[%s3977_s23 + $0x20] sm:$0xf] }
  0x15   : > { %v2073_v14 = vld [vmem:[%s3977_s23 + $0x20] sm:$0xf] }
  0x16   : > { %266 = vrot.lane.b32.xlu0 %v3992_v6, %s3915_s24  ;;  %264 = vrot.lane.b32.xlu1 %v3989_v5, %s3915_s24  ;;  %v2452_v55 = vld [vmem:[%s3977_s23 + $0x20] sm:$0xf] }
  0x1a   : > { %270 = vrot.lane.b32.xlu1 %v4001_v8, %s3915_s24  ;;  %260 = vrot.lane.b32.xlu0 %v3998_v7, %s3915_s24 }
  0x1e   : > { %274 = vrot.lane.b32.xlu1 %v207_v10, %s3915_s24  ;;  %268 = vrot.lane.b32.xlu0 %v4007_v9, %s3915_s24 }
  0x22   : > { %982 = vrot.lane.b32.xlu1 %v3980_v3, %s3916_s25  ;;  %272 = vrot.lane.b32.xlu0 %v4013_v11, %s3915_s24 }
  0x26   : > { %984 = vrot.lane.b32.xlu1 %v3989_v5, %s3916_s25  ;;  %980 = vrot.lane.b32.xlu0 %v3998_v7, %s3916_s25 }
  0x2a   : > { %988 = vrot.lane.b32.xlu1 %v4007_v9, %s3916_s25  ;;  %978 = vrot.lane.b32.xlu0 %v3983_v4, %s3916_s25 }
  0x2e   : > { %1023 = vrot.lane.b32.xlu1 %v3965_v0, %s3917_s26  ;;  %986 = vrot.lane.b32.xlu0 %v3992_v6, %s3916_s25 }
  0x32   : > { %994 = vrot.lane.b32.xlu1 %v927_v12, %s3916_s25  ;;  %990 = vrot.lane.b32.xlu0 %v4001_v8, %s3916_s25 }
  0x36   : > { %1361 = vrot.lane.b32.xlu1 %v3980_v3, %s3918_s27  ;;  %992 = vrot.lane.b32.xlu0 %v4013_v11, %s3916_s25 }
  0x3a   : > { %1396 = vrot.lane.b32.xlu1 %v3980_v3, %s3919_s28  ;;  %1359 = vrot.lane.b32.xlu0 %v3998_v7, %s3918_s27 }
  0x3e   : > { %1392 = vrot.lane.b32.xlu1 %v3983_v4, %s3919_s28  ;;  %1394 = vrot.lane.b32.xlu0 %v3998_v7, %s3919_s28 }
  0x42   : > { %1365 = vrot.lane.b32.xlu1 %v3992_v6, %s3918_s27  ;;  %1357 = vrot.lane.b32.xlu0 %v3983_v4, %s3918_s27 }
  0x46   : > { %1400 = vrot.lane.b32.xlu1 %v3992_v6, %s3919_s28  ;;  %1363 = vrot.lane.b32.xlu0 %v3989_v5, %s3918_s27 }
  0x4a   : > { %1369 = vrot.lane.b32.xlu1 %v4001_v8, %s3918_s27  ;;  %1398 = vrot.lane.b32.xlu0 %v3989_v5, %s3919_s28 }
  0x4e   : > { %1404 = vrot.lane.b32.xlu1 %v4001_v8, %s3919_s28  ;;  %1367 = vrot.lane.b32.xlu0 %v4007_v9, %s3918_s27 }
  0x52   : > { %1371 = vrot.lane.b32.xlu1 %v4013_v11, %s3918_s27  ;;  %1402 = vrot.lane.b32.xlu0 %v4007_v9, %s3919_s28 }
  0x56   : > { %1406 = vrot.lane.b32.xlu1 %v4013_v11, %s3919_s28  ;;  %1437 = vrot.lane.b32.xlu0 %v3965_v0, %s3920_s29 }
  0x5a   : > { %1757 = vrot.lane.b32.xlu1 %v3965_v0, %s3921_s30  ;;  %1373 = vrot.lane.b32.xlu0 %v1347_v13, %s3918_s27 }
  0x5e   : > { %2087 = vrot.lane.b32.xlu1 %v3980_v3, %s3922_s5  ;;  %1408 = vrot.lane.b32.xlu0 %v1347_v13, %s3919_s28 }
  0x62   : > { %2089 = vrot.lane.b32.xlu1 %v3989_v5, %s3922_s5  ;;  %2085 = vrot.lane.b32.xlu0 %v3998_v7, %s3922_s5 }
  0x66   : > { %2093 = vrot.lane.b32.xlu1 %v4007_v9, %s3922_s5  ;;  %2083 = vrot.lane.b32.xlu0 %v3983_v4, %s3922_s5 }
  0x6a   : > { %2128 = vrot.lane.b32.xlu1 %v3965_v0, %s3923_s6  ;;  %2091 = vrot.lane.b32.xlu0 %v3992_v6, %s3922_s5 }
  0x6e   : > { %2099 = vrot.lane.b32.xlu1 %v2073_v14, %s3922_s5  ;;  %2095 = vrot.lane.b32.xlu0 %v4001_v8, %s3922_s5 }
  0x72   : > { %2466 = vrot.lane.b32.xlu1 %v3980_v3, %s3924_s7  ;;  %2097 = vrot.lane.b32.xlu0 %v4013_v11, %s3922_s5 }
  0x76   : > { %2501 = vrot.lane.b32.xlu1 %v3980_v3, %s3925_s8  ;;  %2464 = vrot.lane.b32.xlu0 %v3998_v7, %s3924_s7 }
  0x78   : > { %v4078_v15 = vpop.permute.xlu1 %307 }
  0x7a   : > { %2497 = vrot.lane.b32.xlu1 %v3983_v4, %s3925_s8  ;;  %2499 = vrot.lane.b32.xlu0 %v3998_v7, %s3925_s8 }
  0x7e   : > { %2470 = vrot.lane.b32.xlu1 %v3992_v6, %s3924_s7  ;;  %2462 = vrot.lane.b32.xlu0 %v3983_v4, %s3924_s7 }
  0x82   : > { %2505 = vrot.lane.b32.xlu1 %v3992_v6, %s3925_s8  ;;  %2468 = vrot.lane.b32.xlu0 %v3989_v5, %s3924_s7 }
  0x84   : > { %v263_v17 = vpop.permute.xlu0 %262  ;;  %v259_v18 = vpop.permute.xlu1 %258 }
  0x86   : > { %2474 = vrot.lane.b32.xlu1 %v4001_v8, %s3924_s7  ;;  %2503 = vrot.lane.b32.xlu0 %v3989_v5, %s3925_s8 }
  0x88   : > { %v267_v21 = vpop.permute.xlu0 %266  ;;  %v265_v22 = vpop.permute.xlu1 %264 }
  0x89   : > { %v4095_v24 = vsel %vm276_vm0, %v265_v22, %v267_v21  ;;  %v4098_v25 = vsel %vm276_vm0, %v263_v17, %v265_v22 }
  0x8a   : > { %2509 = vrot.lane.b32.xlu1 %v4001_v8, %s3925_s8  ;;  %3699 = vmatprep.subr.msk.mxu1 %vm312_vm1, %v4095_v24  ;;  %v300_v63 = vsel %vm244_vm9, %v4095_v24, %v3989_v5  ;;  %v299_v10 = vsel %vm243_vm8, %v4098_v25, %v3980_v3 }
  0x8b   : > { %2472 = vrot.lane.b32.xlu0 %v4007_v9, %s3924_s7  ;;  %3700 = vmatpush1.msk.msra.mxu1 %vm312_vm1, %v4098_v25 }
  0x8c   : > { %3701 = vmatmul.mubr.msk.f32.vlgmr.msra.gmra.mrb[0].mxu1 %vm309_vm3, %v4078_v15  ;;  %v271_v31 = vpop.permute.xlu1 %270  ;;  %v261_v32 = vpop.permute.xlu0 %260 }
  0x8d   : > { %v4121_v35 = vsel %vm276_vm0, %v261_v32, %v263_v17  ;;  %v4128_v37 = vsel %vm276_vm0, %v259_v18, %v261_v32  ;;  %606 = vmatprep.mubr.f32.mxu1 %v3914_v2  ;;  %v4272_v17 = vrot.slane %v4152_v43, %v219_v30 }
  0x8e   : > { %2476 = vrot.lane.b32.xlu1 %v4013_v11, %s3924_s7  ;;  %3696 = vmatprep.subr.msk.mxu0 %vm312_vm1, %v4121_v35  ;;  %v298_v50 = vsel %vm242_vm5, %v4121_v35, %v3998_v7  ;;  %v297_v52 = vsel %vm241_vm6, %v4128_v37, %v3983_v4 }
  0x8f   : > { %2507 = vrot.lane.b32.xlu0 %v4007_v9, %s3925_s8  ;;  %3697 = vmatpush1.msk.msra.mxu0 %vm312_vm1, %v4128_v37  ;;  %vm4673_vm2 = vcmp.eq.s32.totalorder %v4272_v17, 1 }
  0x90   : > { %v275_v41 = vpop.permute.xlu1 %274  ;;  %3698 = vmatmul.mubr.msk.f32.vlgmr.msra.gmra.mrb[0].mxu0 %vm309_vm3, %v4078_v15  ;;  %v269_v42 = vpop.permute.xlu0 %268 }
  0x91   : > { %v4157_v45 = vsel %vm276_vm0, %v267_v21, %v269_v42  ;;  %v4160_v46 = vsel %vm276_vm0, %v269_v42, %v271_v31  ;;  %535 = vmatprep.mubr.f32.mxu0 %v3914_v2 }
  0x92   : > { %2511 = vrot.lane.b32.xlu1 %v4013_v11, %s3925_s8  ;;  %3702 = vmatprep.subr.msk.mxu0 %vm312_vm1, %v4160_v46  ;;  %v302_v60 = vsel %vm246_vm7, %v4160_v46, %v4007_v9  ;;  %v301_v12 = vsel %vm4676_vm10, %v4157_v45, %v3992_v6 }
  0x93   : > { %2542 = vrot.lane.b32.xlu0 %v3965_v0, %s3926_s13  ;;  %3703 = vmatpush1.msk.msra.mxu0 %vm312_vm1, %v4157_v45 }
  0x94   : > { %v983_v53 = vpop.permute.xlu1 %982  ;;  %3704 = vmatmul.mubr.msk.f32.vlgmr.msra.gmra.mrb[2].mxu0 %vm309_vm3, %v4078_v15  ;;  %3708 = vmatprep.subr.msk.mxu0 %vm312_vm1, %v298_v50  ;;  %v273_v54 = vpop.permute.xlu0 %272 }
  0x95   : > { %v4201_v57 = vsel %vm276_vm0, %v271_v31, %v273_v54  ;;  %v4204_v58 = vsel %vm276_vm0, %v273_v54, %v275_v41  ;;  %3709 = vmatpush1.msk.msra.mxu0 %vm312_vm1, %v297_v52  ;;  %703 = vmatprep.mubr.f32.mxu0 %v3914_v2  ;;  %vm4672_vm0 = vcmp.eq.s32.totalorder %v4267_v16, 1  ;;  %v4328_v31 = vrot.slane %v4152_v43, %v235_v49 }
  0x96   : > { %2862 = vrot.lane.b32.xlu1 %v3965_v0, %s3927_s14  ;;  %3705 = vmatprep.subr.msk.mxu1 %vm312_vm1, %v4204_v58  ;;  %v303_v19 = vsel %vm247_vm14, %v4201_v57, %v4001_v8 }
  0x97   : > { %2478 = vrot.lane.b32.xlu0 %v2452_v55, %s3924_s7  ;;  %3714 = vmatprep.subr.msk.mxu0 %vm312_vm1, %v302_v60 }
  0x98   : > { %3706 = vmatpush1.msk.msra.mxu1 %vm312_vm1, %v4201_v57  ;;  %v985_v62 = vpop.permute.xlu1 %984  ;;  %3710 = vmatmul.mubr.msk.f32.vlgmr.msra.gmra.mrb[0].mxu0 %vm309_vm3, %v3965_v0  ;;  %v981_v1 = vpop.permute.xlu0 %980 }
  0x99   : > { %3707 = vmatmul.mubr.msk.f32.vlgmr.msra.gmra.mrb[2].mxu1 %vm309_vm3, %v4078_v15  ;;  %3711 = vmatprep.subr.msk.mxu1 %vm312_vm1, %v300_v63  ;;  %v998_v13 = vsel %vm996_vm11, %v981_v1, %v983_v53  ;;  %v304_v15 = vsel %vm248_vm13, %v4204_v58, %v4013_v11  ;;  %v999_v26 = vsel %vm996_vm11, %v983_v53, %v985_v62 }
  0x9a   : > { %3715 = vmatpush1.msk.msra.mxu0 %vm312_vm1, %v301_v12  ;;  %3712 = vmatpush1.msk.msra.mxu1 %vm312_vm1, %v299_v10  ;;  %v1014_v14 = vsel %vm962_vm12, %v4121_v35, %v998_v13  ;;  %v1015_v30 = vsel %vm4673_vm2, %v4098_v25, %v999_v26  ;;  %vm4675_vm2 = vcmp.eq.s32.totalorder %v4328_v31, 1 }
  0x9b   : > { %3192 = vrot.lane.b32.xlu1 %v3980_v3, %s3928_s17  ;;  %2513 = vrot.lane.b32.xlu0 %v2452_v55, %s3925_s8 }
  0x9c   : > { %3717 = vmatprep.subr.msk.mxu1 %vm312_vm1, %v304_v15  ;;  %774 = vmatprep.mubr.f32.mxu1 %v3914_v2  ;;  %v989_v3 = vpop.permute.xlu1 %988  ;;  %v979_v18 = vpop.permute.xlu0 %978 }
  0x9d   : > { %3720 = vmatprep.subr.msk.mxu0 %vm312_vm1, %v1014_v14  ;;  %3713 = vmatmul.mubr.msk.f32.vlgmr.msra.gmra.mrb[0].mxu1 %vm309_vm3, %v3965_v0  ;;  %v997_v21 = vsel %vm996_vm11, %v979_v18, %v981_v1 }
  0x9e   : > { %3718 = vmatpush1.msk.msra.mxu1 %vm312_vm1, %v303_v19  ;;  %v1013_v22 = vsel %vm4674_vm15, %v4128_v37, %v997_v21  ;;  %845 = vmatprep.mubr.f32.mxu0 %v3914_v2 }
  0x9f   : > { %3194 = vrot.lane.b32.xlu1 %v3989_v5, %s3928_s17  ;;  %3190 = vrot.lane.b32.xlu0 %v3998_v7, %s3928_s17  ;;  %v4307_v5 = vrot.slane %v4152_v43, %v227_v38 }
  0xa0   : > { %3716 = vmatmul.mubr.msk.f32.vlgmr.msra.gmra.mrb[2].mxu0 %vm309_vm3, %v3965_v0  ;;  %v1024_v27 = vpop.permute.xlu1 %1023  ;;  %916 = vmatprep.mubr.f32.mxu1 %v3914_v2  ;;  %v987_v7 = vpop.permute.xlu0 %986 }
  0xa1   : > { %3721 = vmatpush1.msk.msra.mxu0 %vm312_vm1, %v1013_v22  ;;  %v1000_v28 = vsel %vm996_vm11, %v985_v62, %v987_v7  ;;  %3719 = vmatmul.mubr.msk.f32.vlgmr.msra.gmra.mrb[2].mxu1 %vm309_vm3, %v3965_v0  ;;  %v1001_v25 = vsel %vm996_vm11, %v987_v7, %v989_v3 }
  0xa2   : > { %v1016_v29 = vsel %vm4672_vm0, %v4095_v24, %v1000_v28  ;;  %1115 = vmatprep.mubr.f32.mxu0 %v3914_v2  ;;  %1186 = vmatprep.mubr.f32.mxu1 %v3914_v2  ;;  %v4333_v24 = vrot.slane %v4152_v43, %v239_v44  ;;  %vm965_vm0 = vcmp.eq.s32.totalorder %v4307_v5, 1 }
  0xa3   : > { %3188 = vrot.lane.b32.xlu0 %v3983_v4, %s3928_s17  ;;  %3723 = vmatprep.subr.msk.mxu1 %vm312_vm1, %v1016_v29  ;;  %v1017_v35 = vsel %vm965_vm0, %v4157_v45, %v1001_v25 }
  0xa4   : > { %v995_v32 = vpop.permute.xlu1 %994  ;;  %3724 = vmatpush1.msk.msra.mxu1 %vm312_vm1, %v1015_v30  ;;  %v991_v4 = vpop.permute.xlu0 %990  ;;  %3233 = vrot.lane.b32.xlu1 %v3965_v0, %s3919_s28  ;;  %vm968_vm15 = vcmp.eq.s32.totalorder %v4333_v24, 1 }
  0xa5   : > { %v1002_v34 = vsel %vm996_vm11, %v989_v3, %v991_v4  ;;  %3722 = vmatmul.mubr.msk.f32.vlgmr.msra.gmra.mrb[0].mxu0 %vm309_vm3, %v1024_v27  ;;  %3725 = vmatmul.mubr.msk.f32.vlgmr.msra.gmra.mrb[0].mxu1 %vm309_vm3, %v1024_v27 }
  0xa6   : > { %v1018_v20 = vsel %vm966_vm4, %v4160_v46, %v1002_v34  ;;  %1257 = vmatprep.mubr.f32.mxu0 %v3914_v2  ;;  %1328 = vmatprep.mubr.f32.mxu1 %v3914_v2 }
  0xa7   : > { %3196 = vrot.lane.b32.xlu0 %v3992_v6, %s3928_s17  ;;  %3726 = vmatprep.subr.msk.mxu0 %vm312_vm1, %v1018_v20  ;;  %v3178_v6 = vld [vmem:[%s3977_s23 + $0x20] sm:$0xf]  ;;  %s197_s23 = scalar_lea.vmem %s4671_s4, %s3806_s20 }
  0xa8   : > { %v1362_v0 = vpop.permute.xlu1 %1361  ;;  %3727 = vmatpush1.msk.msra.mxu0 %vm312_vm1, %v1017_v35  ;;  %v993_v37 = vpop.permute.xlu0 %992  ;;  %3200 = vrot.lane.b32.xlu1 %v4001_v8, %s3928_s17 }
  0xa9   : > { %v1003_v38 = vsel %vm996_vm11, %v991_v4, %v993_v37  ;;  %v1004_v41 = vsel %vm996_vm11, %v993_v37, %v995_v32  ;;  %3728 = vmatmul.mubr.msk.f32.vlgmr.msra.gmra.mrb[2].mxu0 %vm309_vm3, %v1024_v27  ;;  %vm1375_vm11 = vcmask 777216  }
  0xaa   : > { %v1019_v42 = vsel %vm4675_vm2, %v4201_v57, %v1003_v38  ;;  %v1020_v43 = vsel %vm968_vm15, %v4204_v58, %v1004_v41  ;;  %1529 = vmatprep.mubr.f32.mxu0 %v3914_v2  ;;  %vm1410_vm2 = vcmask 785408  }
  0xab   : > { %3198 = vrot.lane.b32.xlu0 %v4007_v9, %s3928_s17  ;;  %3729 = vmatprep.subr.msk.mxu1 %vm312_vm1, %v1020_v43  ;;  %v3553_v9 = vld [vmem:[%s4669_s2] sm:$0xff] }
  0xac   : > { %v1397_v8 = vpop.permute.xlu1 %1396  ;;  %3730 = vmatpush1.msk.msra.mxu1 %vm312_vm1, %v1019_v42  ;;  %v1360_v44 = vpop.permute.xlu0 %1359  ;;  %3204 = vrot.lane.b32.xlu1 %v3178_v6, %s3928_s17 }
  0xad   : > { %3731 = vmatmul.mubr.msk.f32.vlgmr.msra.gmra.mrb[2].mxu1 %vm309_vm3, %v1024_v27  ;;  %v4383_v49 = vsel %vm1375_vm11, %v1360_v44, %v1362_v0 }
  0xae   : > { %1600 = vmatprep.mubr.f32.mxu1 %v3914_v2 }
  0xaf   : > { %3202 = vrot.lane.b32.xlu0 %v4013_v11, %s3928_s17 }
  0xb0   : > { %v1393_v45 = vpop.permute.xlu1 %1392  ;;  %v1395_v46 = vpop.permute.xlu0 %1394 }
  0xb1   : > { %v1412_v50 = vsel %vm1410_vm2, %v1395_v46, %v1397_v8  ;;  %v1411_v54 = vsel %vm1410_vm2, %v1393_v45, %v1395_v46 }
  0xb2   : > { %v1428_v52 = vsel %vm242_vm5, %v4383_v49, %v1412_v50 }
  0xb3   : > { %3732 = vmatprep.subr.msk.mxu0 %vm312_vm1, %v1428_v52  ;;  %3556 = vperm.xlu0 %3897, %v3553_v9  }
  0xb4   : > { %v1366_v53 = vpop.permute.xlu1 %1365  ;;  %v1358_v11 = vpop.permute.xlu0 %1357 }
  0xb5   : > { %v4392_v55 = vsel %vm1375_vm11, %v1358_v11, %v1360_v44 }
  0xb6   : > { %v1427_v57 = vsel %vm241_vm6, %v4392_v55, %v1411_v54 }
  0xb7   : > { %3733 = vmatpush1.msk.msra.mxu0 %vm312_vm1, %v1427_v57 }
  0xb8   : > { %v1401_v58 = vpop.permute.xlu1 %1400  ;;  %v1364_v60 = vpop.permute.xlu0 %1363 }
  0xb9   : > { %v4399_v1 = vsel %vm1375_vm11, %v1362_v0, %v1364_v60  ;;  %v4402_v10 = vsel %vm1375_vm11, %v1364_v60, %v1366_v53 }
  0xbc   : > { %v1370_v62 = vpop.permute.xlu1 %1369  ;;  %v1399_v63 = vpop.permute.xlu0 %1398 }
  0xbd   : > { %v1413_v12 = vsel %vm1410_vm2, %v1397_v8, %v1399_v63  ;;  %v1414_v13 = vsel %vm1410_vm2, %v1399_v63, %v1401_v58 }
  0xbe   : > { %v1429_v14 = vsel %vm243_vm8, %v4399_v1, %v1413_v12  ;;  %v1430_v15 = vsel %vm244_vm9, %v4402_v10, %v1414_v13 }
  0xbf   : > { %3735 = vmatprep.subr.msk.mxu1 %vm312_vm1, %v1430_v15 }
  0xc0   : > { %v1405_v3 = vpop.permute.xlu1 %1404  ;;  %3736 = vmatpush1.msk.msra.mxu1 %vm312_vm1, %v1429_v14  ;;  %v1368_v18 = vpop.permute.xlu0 %1367 }
  0xc1   : > { %v4415_v22 = vsel %vm1375_vm11, %v1368_v18, %v1370_v62  ;;  %v4424_v28 = vsel %vm1375_vm11, %v1366_v53, %v1368_v18 }
  0xc4   : > { %v1372_v19 = vpop.permute.xlu1 %1371  ;;  %v1403_v21 = vpop.permute.xlu0 %1402 }
  0xc5   : > { %v1416_v26 = vsel %vm1410_vm2, %v1403_v21, %v1405_v3  ;;  %v1415_v27 = vsel %vm1410_vm2, %v1401_v58, %v1403_v21  ;;  %v1382_v38 = vsel %vm1375_vm11, %v1370_v62, %v1372_v19 }
  0xc6   : > { %v1432_v7 = vsel %vm246_vm7, %v4415_v22, %v1416_v26  ;;  %v1431_v25 = vsel %vm4676_vm10, %v4424_v28, %v1415_v27  ;;  %vm2101_vm10 = vcmask 769024  }
  0xc7   : > { %3738 = vmatprep.subr.msk.mxu0 %vm312_vm1, %v1432_v7 }
  0xc8   : > { %v1407_v29 = vpop.permute.xlu1 %1406  ;;  %v1438_v30 = vpop.permute.xlu0 %1437 }
  0xc9   : > { %3734 = vmatmul.mubr.msk.f32.vlgmr.msra.gmra.mrb[0].mxu0 %vm309_vm3, %v1438_v30  ;;  %3737 = vmatmul.mubr.msk.f32.vlgmr.msra.gmra.mrb[0].mxu1 %vm309_vm3, %v1438_v30  ;;  %v1417_v34 = vsel %vm1410_vm2, %v1405_v3, %v1407_v29 }
  0xca   : > { %3739 = vmatpush1.msk.msra.mxu0 %vm312_vm1, %v1431_v25  ;;  %1671 = vmatprep.mubr.f32.mxu0 %v3914_v2  ;;  %v1433_v6 = vsel %vm247_vm14, %v1382_v38, %v1417_v34 }
  0xcb   : > { %3744 = vmatprep.subr.msk.mxu0 %vm312_vm1, %v4383_v49  ;;  %1742 = vmatprep.mubr.f32.mxu1 %v3914_v2 }
  0xcc   : > { %v1758_v32 = vpop.permute.xlu1 %1757  ;;  %v1374_v4 = vpop.permute.xlu0 %1373 }
  0xcd   : > { %3740 = vmatmul.mubr.msk.f32.vlgmr.msra.gmra.mrb[2].mxu0 %vm309_vm3, %v1438_v30  ;;  %v1383_v0 = vsel %vm1375_vm11, %v1372_v19, %v1374_v4  ;;  %vm4678_vm11 = vcmp.eq.s32.totalorder %v4267_v16, 1 }
  0xce   : > { %3745 = vmatpush1.msk.msra.mxu0 %vm312_vm1, %v4392_v55  ;;  %1841 = vmatprep.mubr.f32.mxu0 %v3914_v2 }
  0xcf   : > { %3750 = vmatprep.subr.msk.mxu0 %vm312_vm1, %v4415_v22 }
  0xd0   : > { %v2088_v20 = vpop.permute.xlu1 %2087  ;;  %v1409_v35 = vpop.permute.xlu0 %1408 }
  0xd1   : > { %v1418_v37 = vsel %vm1410_vm2, %v1407_v29, %v1409_v35  ;;  %3746 = vmatmul.mubr.msk.f32.vlgmr.msra.gmra.mrb[0].mxu0 %vm309_vm3, %v1758_v32  ;;  %vm4677_vm2 = vcmp.eq.s32.totalorder %v4227_v61, 1 }
  0xd2   : > { %3751 = vmatpush1.msk.msra.mxu0 %vm312_vm1, %v4424_v28  ;;  %v1434_v41 = vsel %vm248_vm13, %v1383_v0, %v1418_v37  ;;  %1983 = vmatprep.mubr.f32.mxu0 %v3914_v2 }
  0xd3   : > { %3741 = vmatprep.subr.msk.mxu1 %vm312_vm1, %v1434_v41 }
  0xd4   : > { %v2090_v42 = vpop.permute.xlu1 %2089  ;;  %3742 = vmatpush1.msk.msra.mxu1 %vm312_vm1, %v1433_v6  ;;  %v2086_v43 = vpop.permute.xlu0 %2085 }
  0xd5   : > { %v2103_v8 = vsel %vm2101_vm10, %v2086_v43, %v2088_v20  ;;  %3743 = vmatmul.mubr.msk.f32.vlgmr.msra.gmra.mrb[2].mxu1 %vm309_vm3, %v1438_v30  ;;  %3747 = vmatprep.subr.msk.mxu1 %vm312_vm1, %v4402_v10 }
  0xd6   : > { %3752 = vmatmul.mubr.msk.f32.vlgmr.msra.gmra.mrb[2].mxu0 %vm309_vm3, %v1758_v32  ;;  %3748 = vmatpush1.msk.msra.mxu1 %vm312_vm1, %v4399_v1  ;;  %v2119_v44 = vsel %vm962_vm12, %v4383_v49, %v2103_v8  ;;  %v2104_v49 = vsel %vm2101_vm10, %v2088_v20, %v2090_v42 }
  0xd7   : > { %3753 = vmatprep.subr.msk.mxu1 %vm312_vm1, %v1383_v0  ;;  %3756 = vmatprep.subr.msk.mxu0 %vm312_vm1, %v2119_v44 }
  0xd8   : > { %v2094_v45 = vpop.permute.xlu1 %2093  ;;  %1912 = vmatprep.mubr.f32.mxu1 %v3914_v2  ;;  %v2084_v46 = vpop.permute.xlu0 %2083  ;;  %2220 = vmatprep.mubr.f32.mxu0 %v3914_v2 }
  0xd9   : > { %v2102_v9 = vsel %vm2101_vm10, %v2084_v46, %v2086_v43  ;;  %3749 = vmatmul.mubr.msk.f32.vlgmr.msra.gmra.mrb[0].mxu1 %vm309_vm3, %v1758_v32 }
  0xda   : > { %v2118_v50 = vsel %vm4677_vm2, %v4392_v55, %v2102_v9  ;;  %3754 = vmatpush1.msk.msra.mxu1 %vm312_vm1, %v1382_v38  ;;  %2054 = vmatprep.mubr.f32.mxu1 %v3914_v2  ;;  %vm4679_vm2 = vcmp.eq.s32.totalorder %v4272_v17, 1 }
  0xdb   : > { %3757 = vmatpush1.msk.msra.mxu0 %vm312_vm1, %v2118_v50  ;;  %v2120_v55 = vsel %vm4679_vm2, %v4399_v1, %v2104_v49  ;;  %vm2480_vm2 = vcmask 515072  }
  0xdc   : > { %v2129_v52 = vpop.permute.xlu1 %2128  ;;  %v2092_v53 = vpop.permute.xlu0 %2091 }
  0xdd   : > { %v2105_v11 = vsel %vm2101_vm10, %v2090_v42, %v2092_v53  ;;  %3755 = vmatmul.mubr.msk.f32.vlgmr.msra.gmra.mrb[2].mxu1 %vm309_vm3, %v1758_v32  ;;  %3758 = vmatmul.mubr.msk.f32.vlgmr.msra.gmra.mrb[0].mxu0 %vm309_vm3, %v2129_v52  ;;  %v2106_v57 = vsel %vm2101_vm10, %v2092_v53, %v2094_v45 }
  0xde   : > { %v2121_v54 = vsel %vm4678_vm11, %v4402_v10, %v2105_v11  ;;  %2291 = vmatprep.mubr.f32.mxu1 %v3914_v2  ;;  %2362 = vmatprep.mubr.f32.mxu0 %v3914_v2  ;;  %v2122_v1 = vsel %vm965_vm0, %v4424_v28, %v2106_v57  ;;  %vm4680_vm11 = vcmp.eq.s32.totalorder %v4328_v31, 1 }
  0xdf   : > { %3759 = vmatprep.subr.msk.mxu1 %vm312_vm1, %v2121_v54 }
  0xe0   : > { %v2100_v58 = vpop.permute.xlu1 %2099  ;;  %3760 = vmatpush1.msk.msra.mxu1 %vm312_vm1, %v2120_v55  ;;  %v2096_v60 = vpop.permute.xlu0 %2095 }
  0xe1   : > { %v2107_v62 = vsel %vm2101_vm10, %v2094_v45, %v2096_v60  ;;  %3761 = vmatmul.mubr.msk.f32.vlgmr.msra.gmra.mrb[0].mxu1 %vm309_vm3, %v2129_v52 }
  0xe2   : > { %v2123_v63 = vsel %vm966_vm4, %v4415_v22, %v2107_v62  ;;  %2433 = vmatprep.mubr.f32.mxu1 %v3914_v2 }
  0xe3   : > { %3762 = vmatprep.subr.msk.mxu0 %vm312_vm1, %v2123_v63 }
  0xe4   : > { %v2467_v10 = vpop.permute.xlu1 %2466  ;;  %3763 = vmatpush1.msk.msra.mxu0 %vm312_vm1, %v2122_v1  ;;  %v2098_v12 = vpop.permute.xlu0 %2097 }
  0xe5   : > { %v2108_v13 = vsel %vm2101_vm10, %v2096_v60, %v2098_v12  ;;  %v2109_v14 = vsel %vm2101_vm10, %v2098_v12, %v2100_v58  ;;  %3764 = vmatmul.mubr.msk.f32.vlgmr.msra.gmra.mrb[2].mxu0 %vm309_vm3, %v2129_v52  ;;  %vm2515_vm10 = vcmask 523264  }
  0xe6   : > { %v2124_v15 = vsel %vm4680_vm11, %v1382_v38, %v2108_v13  ;;  %v2125_v3 = vsel %vm968_vm15, %v1383_v0, %v2109_v14  ;;  %2634 = vmatprep.mubr.f32.mxu0 %v3914_v2 }
  0xe7   : > { %3765 = vmatprep.subr.msk.mxu1 %vm312_vm1, %v2125_v3 }
  0xe8   : > { %v2502_v18 = vpop.permute.xlu1 %2501  ;;  %3766 = vmatpush1.msk.msra.mxu1 %vm312_vm1, %v2124_v15  ;;  %v2465_v19 = vpop.permute.xlu0 %2464 }
  0xe9   : > { %3767 = vmatmul.mubr.msk.f32.vlgmr.msra.gmra.mrb[2].mxu1 %vm309_vm3, %v2129_v52  ;;  %v4517_v26 = vsel %vm2480_vm2, %v2465_v19, %v2467_v10 }
  0xea   : > { %2705 = vmatprep.mubr.f32.mxu1 %v3914_v2 }
  0xec   : > { %v2498_v21 = vpop.permute.xlu1 %2497  ;;  %v2500_v22 = vpop.permute.xlu0 %2499 }
  0xed   : > { %v2517_v27 = vsel %vm2515_vm10, %v2500_v22, %v2502_v18  ;;  %v2516_v30 = vsel %vm2515_vm10, %v2498_v21, %v2500_v22 }
  0xee   : > { %v2533_v7 = vsel %vm242_vm5, %v4517_v26, %v2517_v27  ;;  %vm4681_vm5 = vcmp.eq.s32.totalorder %v4169_v48, 1 }
  0xef   : > { %3768 = vmatprep.subr.msk.mxu0 %vm312_vm1, %v2533_v7 }
  0xf0   : > { %v2471_v28 = vpop.permute.xlu1 %2470  ;;  %v2463_v29 = vpop.permute.xlu0 %2462 }
  0xf1   : > { %v4526_v25 = vsel %vm2480_vm2, %v2463_v29, %v2465_v19 }
  0xf2   : > { %v2532_v32 = vsel %vm241_vm6, %v4526_v25, %v2516_v30  ;;  %vm3206_vm6 = vcmask 506880  }
  0xf3   : > { %3769 = vmatpush1.msk.msra.mxu0 %vm312_vm1, %v2532_v32 }
  0xf4   : > { %v2506_v4 = vpop.permute.xlu1 %2505  ;;  %v2469_v34 = vpop.permute.xlu0 %2468 }
  0xf5   : > { %v4533_v35 = vsel %vm2480_vm2, %v2467_v10, %v2469_v34  ;;  %v4536_v0 = vsel %vm2480_vm2, %v2469_v34, %v2471_v28 }
  0xf8   : > { %v2475_v20 = vpop.permute.xlu1 %2474  ;;  %v2504_v33 = vpop.permute.xlu0 %2503 }
  0xf9   : > { %v2518_v37 = vsel %vm2515_vm10, %v2502_v18, %v2504_v33  ;;  %v2519_v38 = vsel %vm2515_vm10, %v2504_v33, %v2506_v4 }
  0xfa   : > { %v2534_v36 = vsel %vm243_vm8, %v4533_v35, %v2518_v37  ;;  %v2535_v41 = vsel %vm244_vm9, %v4536_v0, %v2519_v38  ;;  %vm4683_vm8 = vcmp.eq.s32.totalorder %v4267_v16, 1  ;;  %vm4684_vm9 = vcmp.eq.s32.totalorder %v4272_v17, 1 }
  0xfb   : > { %3771 = vmatprep.subr.msk.mxu1 %vm312_vm1, %v2535_v41 }
  0xfc   : > { %v2510_v6 = vpop.permute.xlu1 %2509  ;;  %3772 = vmatpush1.msk.msra.mxu1 %vm312_vm1, %v2534_v36 }
  0xfd   : > { %v2473_v42 = vpop.permute.xlu0 %2472 }
  0xfe   : > { %v4549_v44 = vsel %vm2480_vm2, %v2473_v42, %v2475_v20  ;;  %v4558_v9 = vsel %vm2480_vm2, %v2471_v28, %v2473_v42 }
 0x100   : > { %v2477_v43 = vpop.permute.xlu1 %2476 }
 0x101   : > { %v2508_v8 = vpop.permute.xlu0 %2507  ;;  %v2487_v57 = vsel %vm2480_vm2, %v2475_v20, %v2477_v43 }
 0x102   : > { %v2521_v45 = vsel %vm2515_vm10, %v2508_v8, %v2510_v6  ;;  %v2520_v40 = vsel %vm2515_vm10, %v2506_v4, %v2508_v8 }
 0x103   : > { %v2537_v47 = vsel %vm246_vm7, %v4549_v44, %v2521_v45  ;;  %v2536_v49 = vsel %vm4681_vm5, %v4558_v9, %v2520_v40  ;;  %vm4682_vm7 = vcmp.eq.s32.totalorder %v4227_v61, 1 }
 0x104   : > { %3774 = vmatprep.subr.msk.mxu0 %vm312_vm1, %v2537_v47  ;;  %v2512_v46 = vpop.permute.xlu1 %2511 }
 0x105   : > { %v2543_v50 = vpop.permute.xlu0 %2542  ;;  %v2522_v48 = vsel %vm2515_vm10, %v2510_v6, %v2512_v46 }
 0x106   : > { %3770 = vmatmul.mubr.msk.f32.vlgmr.msra.gmra.mrb[0].mxu0 %vm309_vm3, %v2543_v50  ;;  %3773 = vmatmul.mubr.msk.f32.vlgmr.msra.gmra.mrb[0].mxu1 %vm309_vm3, %v2543_v50  ;;  %v2538_v60 = vsel %vm247_vm14, %v2487_v57, %v2522_v48 }
 0x107   : > { %3775 = vmatpush1.msk.msra.mxu0 %vm312_vm1, %v2536_v49  ;;  %2776 = vmatprep.mubr.f32.mxu0 %v3914_v2 }
 0x108   : > { %3780 = vmatprep.subr.msk.mxu0 %vm312_vm1, %v4517_v26  ;;  %v2863_v39 = vpop.permute.xlu1 %2862  ;;  %2847 = vmatprep.mubr.f32.mxu1 %v3914_v2 }
 0x109   : > { %v2479_v52 = vpop.permute.xlu0 %2478 }
 0x10a   : > { %3776 = vmatmul.mubr.msk.f32.vlgmr.msra.gmra.mrb[2].mxu0 %vm309_vm3, %v2543_v50  ;;  %v2488_v54 = vsel %vm2480_vm2, %v2477_v43, %v2479_v52 }
 0x10b   : > { %3781 = vmatpush1.msk.msra.mxu0 %vm312_vm1, %v4526_v25  ;;  %2946 = vmatprep.mubr.f32.mxu0 %v3914_v2 }
 0x10c   : > { %3786 = vmatprep.subr.msk.mxu0 %vm312_vm1, %v4549_v44 }
 0x10d   : > { %v3193_v53 = vpop.permute.xlu1 %3192  ;;  %v2514_v11 = vpop.permute.xlu0 %2513 }
 0x10e   : > { %v2523_v55 = vsel %vm2515_vm10, %v2512_v46, %v2514_v11  ;;  %3782 = vmatmul.mubr.msk.f32.vlgmr.msra.gmra.mrb[0].mxu0 %vm309_vm3, %v2863_v39 }
 0x10f   : > { %3787 = vmatpush1.msk.msra.mxu0 %vm312_vm1, %v4558_v9  ;;  %v2539_v58 = vsel %vm248_vm13, %v2488_v54, %v2523_v55  ;;  %3088 = vmatprep.mubr.f32.mxu0 %v3914_v2 }
 0x110   : > { %3777 = vmatprep.subr.msk.mxu1 %vm312_vm1, %v2539_v58 }
 0x111   : > { %3778 = vmatpush1.msk.msra.mxu1 %vm312_vm1, %v2538_v60  ;;  %v3191_v62 = vpop.permute.xlu0 %3190  ;;  %v3195_v63 = vpop.permute.xlu1 %3194 }
 0x112   : > { %v3208_v1 = vsel %vm3206_vm6, %v3191_v62, %v3193_v53  ;;  %3779 = vmatmul.mubr.msk.f32.vlgmr.msra.gmra.mrb[2].mxu1 %vm309_vm3, %v2543_v50  ;;  %3783 = vmatprep.subr.msk.mxu1 %vm312_vm1, %v4536_v0  ;;  %v3209_v51 = vsel %vm3206_vm6, %v3193_v53, %v3195_v63 }
 0x113   : > { %3788 = vmatmul.mubr.msk.f32.vlgmr.msra.gmra.mrb[2].mxu0 %vm309_vm3, %v2863_v39  ;;  %3784 = vmatpush1.msk.msra.mxu1 %vm312_vm1, %v4533_v35  ;;  %v3224_v56 = vsel %vm962_vm12, %v4517_v26, %v3208_v1  ;;  %v3225_v18 = vsel %vm4684_vm9, %v4533_v35, %v3209_v51  ;;  %vm4685_vm12 = vmmov %vm4680_vm11 }
 0x114   : > { %3789 = vmatprep.subr.msk.mxu1 %vm312_vm1, %v2488_v54  ;;  %3792 = vmatprep.subr.msk.mxu0 %vm312_vm1, %v3224_v56 }
 0x115   : > { %3017 = vmatprep.mubr.f32.mxu1 %v3914_v2  ;;  %v3189_v59 = vpop.permute.xlu0 %3188  ;;  %3325 = vmatprep.mubr.f32.mxu0 %v3914_v2 }
 0x116   : > { %v3207_v10 = vsel %vm3206_vm6, %v3189_v59, %v3191_v62  ;;  %3785 = vmatmul.mubr.msk.f32.vlgmr.msra.gmra.mrb[0].mxu1 %vm309_vm3, %v2863_v39  ;;  %v3234_v12 = vpop.permute.xlu1 %3233 }
 0x117   : > { %v3223_v13 = vsel %vm4682_vm7, %v4526_v25, %v3207_v10  ;;  %3790 = vmatpush1.msk.msra.mxu1 %vm312_vm1, %v2487_v57  ;;  %3159 = vmatprep.mubr.f32.mxu1 %v3914_v2 }
 0x118   : > { %3793 = vmatpush1.msk.msra.mxu0 %vm312_vm1, %v3223_v13 }
 0x119   : > { %3794 = vmatmul.mubr.msk.f32.vlgmr.msra.gmra.mrb[0].mxu0 %vm309_vm3, %v3234_v12  ;;  %v3197_v14 = vpop.permute.xlu0 %3196 }
 0x11a   : > { %v3210_v15 = vsel %vm3206_vm6, %v3195_v63, %v3197_v14  ;;  %3791 = vmatmul.mubr.msk.f32.vlgmr.msra.gmra.mrb[2].mxu1 %vm309_vm3, %v2863_v39  ;;  %v3201_v3 = vpop.permute.xlu1 %3200  ;;  %3467 = vmatprep.mubr.f32.mxu0 %v3914_v2 }
 0x11b   : > { %v3226_v61 = vsel %vm4683_vm8, %v4536_v0, %v3210_v15  ;;  %3396 = vmatprep.mubr.f32.mxu1 %v3914_v2 }
 0x11c   : > { %3795 = vmatprep.subr.msk.mxu1 %vm312_vm1, %v3226_v61 }
 0x11d   : > { %3796 = vmatpush1.msk.msra.mxu1 %vm312_vm1, %v3225_v18  ;;  %v3199_v19 = vpop.permute.xlu0 %3198 }
 0x11e   : > { %v3211_v21 = vsel %vm3206_vm6, %v3197_v14, %v3199_v19  ;;  %v3212_v22 = vsel %vm3206_vm6, %v3199_v19, %v3201_v3  ;;  %3797 = vmatmul.mubr.msk.f32.vlgmr.msra.gmra.mrb[0].mxu1 %vm309_vm3, %v3234_v12  ;;  %v3205_v26 = vpop.permute.xlu1 %3204 }
 0x11f   : > { %v3227_v16 = vsel %vm965_vm0, %v4558_v9, %v3211_v21  ;;  %v3228_v17 = vsel %vm966_vm4, %v4549_v44, %v3212_v22  ;;  %3538 = vmatprep.mubr.f32.mxu1 %v3914_v2 }
 0x120   : > { %3798 = vmatprep.subr.msk.mxu0 %vm312_vm1, %v3228_v17 }
 0x121   : > { %3799 = vmatpush1.msk.msra.mxu0 %vm312_vm1, %v3227_v16  ;;  %v3203_v27 = vpop.permute.xlu0 %3202 }
 0x122   : > { %v3213_v7 = vsel %vm3206_vm6, %v3201_v3, %v3203_v27  ;;  %v3214_v28 = vsel %vm3206_vm6, %v3203_v27, %v3205_v26  ;;  %3800 = vmatmul.mubr.msk.f32.vlgmr.msra.gmra.mrb[2].mxu0 %vm309_vm3, %v3234_v12 }
 0x123   : > { %v3229_v5 = vsel %vm4685_vm12, %v2487_v57, %v3213_v7  ;;  %v3230_v23 = vsel %vm968_vm15, %v2488_v54, %v3214_v28 }
 0x124   : > { %3801 = vmatprep.subr.msk.mxu1 %vm312_vm1, %v3230_v23 }
 0x125   : > { %3802 = vmatpush1.msk.msra.mxu1 %vm312_vm1, %v3229_v5 }
 0x126   : > { %3803 = vmatmul.mubr.msk.f32.vlgmr.msra.gmra.mrb[2].mxu1 %vm309_vm3, %v3234_v12 }
 0x132   : > { %v3557_v2 = vpop.permute.xlu0 %3556 }
 0x1ec   : > { %v3327_v29 = vpop.f32.mrb[0].mxu0 }
 0x1ed   : > { %v3329_v30 = vpop.f32.mrb[1].mxu0  ;;  %v3559_v25 = vadd.f32 %v3557_v2, %v3327_v29 }
 0x1ee   : > { %v3560_v32 = vadd.f32 %v3557_v2, %v3329_v30 }
 0x1ef   : > { %v4648_v4 = vmax.f32 %v3559_v25, 0.0 }
 0x1f0   : > { %v4650_v34 = vmax.f32 %v3560_v32, 0.0 }
 0x1f1   : > { %v3398_v31 = vpop.f32.mrb[0].mxu1  ;;  %v3584_v24 = vmul.f32 %v4648_v4, %v4648_v4 }
 0x1f2   : > { %v3585_v20 = vmul.f32 %v4650_v34, %v4650_v34  ;;  %v3561_v33 = vadd.f32 %v3557_v2, %v3398_v31  ;;  %v3400_v35 = vpop.f32.mrb[1].mxu1  ;;  %v3575_v37 = vadd.f32 %v4650_v34, %v4648_v4 }
 0x1f3   : > { %v3562_v0 = vadd.f32 %v3557_v2, %v3400_v35 }
 0x1f4   : > { %v3569_v38 = vmax.f32 %v3561_v33, 0.0  ;;  %v3592_v6 = vadd.f32 %v3585_v20, %v3584_v24 }
 0x1f5   : > { %v3570_v36 = vmax.f32 %v3562_v0, 0.0  ;;  %v3469_v41 = vpop.f32.mrb[2].mxu0 }
 0x1f6   : > { %v3576_v42 = vadd.f32 %v3575_v37, %v3569_v38  ;;  %v3586_v43 = vmul.f32 %v3569_v38, %v3569_v38  ;;  %v3563_v8 = vadd.f32 %v3557_v2, %v3469_v41  ;;  %v3471_v44 = vpop.f32.mrb[3].mxu0 }
 0x1f7   : > { %v3587_v45 = vmul.f32 %v3570_v36, %v3570_v36  ;;  %v3564_v40 = vadd.f32 %v3557_v2, %v3471_v44 }
 0x1f8   : > { %v3593_v47 = vadd.f32 %v3592_v6, %v3586_v43  ;;  %v3577_v46 = vadd.f32 %v3576_v42, %v3570_v36  ;;  %v3571_v9 = vmax.f32 %v3563_v8, 0.0 }
 0x1f9   : > { %v3572_v50 = vmax.f32 %v3564_v40, 0.0  ;;  %v3540_v49 = vpop.f32.mrb[2].mxu1 }
 0x1fa   : > { %v3594_v39 = vadd.f32 %v3593_v47, %v3587_v45  ;;  %v3578_v52 = vadd.f32 %v3577_v46, %v3571_v9  ;;  %v3588_v48 = vmul.f32 %v3571_v9, %v3571_v9  ;;  %v3565_v53 = vadd.f32 %v3557_v2, %v3540_v49  ;;  %v3542_v11 = vpop.f32.mrb[3].mxu1 }
 0x1fb   : > { %v3589_v54 = vmul.f32 %v3572_v50, %v3572_v50  ;;  %v3566_v55 = vadd.f32 %v3557_v2, %v3542_v11 }
 0x1fc   : > { %v3573_v57 = vmax.f32 %v3565_v53, 0.0  ;;  %v3579_v58 = vadd.f32 %v3578_v52, %v3572_v50  ;;  %v3595_v60 = vadd.f32 %v3594_v39, %v3588_v48 }
 0x1fd   : > { %v3574_v62 = vmax.f32 %v3566_v55, 0.0 }
 0x1fe   : > { %v3580_v63 = vadd.f32 %v3579_v58, %v3573_v57  ;;  %v3590_v1 = vmul.f32 %v3573_v57, %v3573_v57  ;;  %v3596_v56 = vadd.f32 %v3595_v60, %v3589_v54 }
 0x1ff   : > { %v3591_v59 = vmul.f32 %v3574_v62, %v3574_v62 }
 0x200   : > { %v3581_v10 = vadd.f32 %v3580_v63, %v3574_v62  ;;  %v3597_v12 = vadd.f32 %v3596_v56, %v3590_v1 }
 0x202   : > { %3582 = vadd.xlane.f32.xlu1 %v3581_v10  ;;  %v3598_v13 = vadd.f32 %v3597_v12, %v3591_v59 }
 0x204   : > { %3599 = vadd.xlane.f32.xlu0 %v3598_v13 }
 0x28f   : > { %v3583_v51 = vpop.xlane.xlu1 %3582 }
 0x290   : > { %v3601_v14 = vmul.f32 0.0009765625, %v3583_v51 }
 0x291   : > { %v3600_v15 = vpop.xlane.xlu0 %3599 }
 0x292   : > { %v3602_v3 = vmul.f32 0.0009765625, %v3600_v15  ;;  %v3603_v61 = vmul.f32 %v3601_v14, %v3601_v14  ;;  %v3606_v22 = vsub.f32 %v4648_v4, %v3601_v14  ;;  %v3607_v16 = vsub.f32 %v4650_v34, %v3601_v14 }
 0x293   : > { %v3608_v17 = vsub.f32 %v3569_v38, %v3601_v14  ;;  %v3609_v26 = vsub.f32 %v3570_v36, %v3601_v14  ;;  %v3610_v7 = vsub.f32 %v3571_v9, %v3601_v14  ;;  %v3611_v28 = vsub.f32 %v3572_v50, %v3601_v14 }
 0x294   : > { %v3604_v18 = vsub.f32 %v3602_v3, %v3603_v61  ;;  %v3612_v5 = vsub.f32 %v3573_v57, %v3601_v14  ;;  %v3613_v23 = vsub.f32 %v3574_v62, %v3601_v14 }
 0x296   : > { %v3605_v19 = vmax.f32 %v3604_v18, 0.0 }
 0x298   : > { %v3614_v21 = vadd.f32 1e-05, %v3605_v19 }
 0x29a   : > { %3902 = vrsqrt.f32 %v3614_v21 }
 0x2a4   : > { %v3903_v27 = vpop.eup %3902 }
 0x2a5   : > { %v3616_v2 = vmul.f32 %v3903_v27, %v3606_v22  ;;  %v3617_v29 = vmul.f32 %v3903_v27, %v3607_v16  ;;  %v3618_v30 = vmul.f32 %v3903_v27, %v3608_v17  ;;  %v3619_v25 = vmul.f32 %v3903_v27, %v3609_v26 }
 0x2a6   : > { %v3620_v32 = vmul.f32 %v3903_v27, %v3610_v7  ;;  %v3621_v31 = vmul.f32 %v3903_v27, %v3611_v28  ;;  %v3622_v4 = vmul.f32 %v3903_v27, %v3612_v5  ;;  %v3623_v24 = vmul.f32 %v3903_v27, %v3613_v23 }
 0x2a7   : > { %3624 = vst [vmem:[%s197_s23] sm:$0xff] %v3616_v2  ;;  %3625 = vst [vmem:[%s197_s23 + $0x8] sm:$0xff] %v3617_v29 }
 0x2a8   : > { %3626 = vst [vmem:[%s197_s23 + $0x10] sm:$0xff] %v3618_v30  ;;  %3627 = vst [vmem:[%s197_s23 + $0x18] sm:$0xff] %v3619_v25 }
 0x2a9   : > { %3628 = vst [vmem:[%s197_s23 + $0x20] sm:$0xff] %v3620_v32  ;;  %3629 = vst [vmem:[%s197_s23 + $0x28] sm:$0xff] %v3621_v31 }
 0x2aa   : > { %3630 = vst [vmem:[%s197_s23 + $0x30] sm:$0xff] %v3622_v4  ;;  %3631 = vst [vmem:[%s197_s23 + $0x38] sm:$0xff] %v3623_v24 }
 0x2ab PF: > { %s14_s15 = sadd.s32 1, %s3910_s15  }
 0x2ac   : > { %p11_p4 = scmp.ge.s32.totalorder %s14_s15, 4  }
 0x2ae   :  { %13 = sbr.rel (!%p11_p4) target bundleno = 1 (0x1), region = 67 }

</bundles_post_ra>
